<compile_context>
chip_gen: v7x
topology: tpu7x:2x2x1
jax: 0.10.0
libtpu: 0.0.40
codegen_flags: <defaults>
</compile_context>

<pallas_src>
import functools

import jax
import jax.numpy as jnp
from jax import lax
from jax.experimental import pallas as pl
from jax.experimental.pallas import tpu as pltpu


def _triple_attention_kernel(scale, eps,
                             hist_ref, utt_ref, resp_ref, w_ref, vec_ref,
                             out_hist_ref, out_resp_ref, out_utt_ref):
    f32 = jnp.float32
    bf16 = jnp.bfloat16

    h = hist_ref[...].astype(f32)           # (Bt, S, D)
    u = utt_ref[...].astype(f32)            # (Bt, S, D)
    r = resp_ref[...].astype(f32)           # (Bt, S, D)
    w = w_ref[...]                          # (D, D) bf16, pre-transposed: x @ w == x @ W.T
    vec = vec_ref[...].astype(f32)          # (3, D): [ff bias; ln gamma; ln beta]
    ff_b, gamma, beta = vec[0:1, :], vec[1:2, :], vec[2:3, :]

    bt, S, D = h.shape

    def attn_pair(q_a, q_b, kv):
        """ScaledDotProductAttention for two queries sharing one K=V.

        Returns (Bt, 2S, D): rows [0:S] -> q_a's context, rows [S:2S] -> q_b's.
        Attention dropout p=0.0 -> identity.
        """
        # Fold the 1/sqrt(D) scale into the (2S, D) queries (cheaper than scaling
        # the (2S, S) score matrix when S > D); matmul operands bf16, f32 accumulate.
        q = (jnp.concatenate([q_a, q_b], axis=1) * scale).astype(bf16)   # (Bt, 2S, D)
        kb = kv.astype(bf16)                                             # (Bt, S, D)
        # Batched dot_general contracting the last dims -> no explicit K transpose.
        s = jnp.einsum("bqd,bkd->bqk", q, kb,
                       preferred_element_type=f32)                       # (Bt, 2S, S)
        s = s - jnp.max(s, axis=-1, keepdims=True)                       # stable softmax
        p = jnp.exp(s)
        # EUP-approx reciprocal: divide moves off the VPU slot.
        p = p * pl.reciprocal(jnp.sum(p, axis=-1, keepdims=True), approx=True)
        return jnp.einsum("bqk,bkd->bqd", p.astype(bf16), kb,
                          preferred_element_type=f32)                    # (Bt, 2S, D)

    # Three stacked attentions instead of six.
    ctx_k_h = attn_pair(u, r, h)   # [context_his2utt ; context_his2resp]
    ctx_k_u = attn_pair(h, r, u)   # [context_utt2his ; context_resp2utt]
    ctx_k_r = attn_pair(h, u, r)   # [context_resp2hist ; context_utt2resp]

    # Shared FeedForward2 = Linear -> ReLU (Dropout(0.1) identity in eval mode):
    # a single (Bt*6S, D) x (D, D) matmul so the weight is pushed into the MXU once.
    ctx_all = jnp.concatenate([ctx_k_h, ctx_k_u, ctx_k_r], axis=1)       # (Bt, 6S, D)
    ctx2d = ctx_all.reshape(bt * 6 * S, D).astype(bf16)
    ff = jnp.maximum(jnp.dot(ctx2d, w, preferred_element_type=f32) + ff_b, 0.0)
    ff = ff.reshape(bt, 6 * S, D)

    c_his2utt = ff[:, 0 * S:1 * S]
    c_his2resp = ff[:, 1 * S:2 * S]
    c_utt2his = ff[:, 2 * S:3 * S]
    c_resp2utt = ff[:, 3 * S:4 * S]
    c_resp2hist = ff[:, 4 * S:5 * S]
    c_utt2resp = ff[:, 5 * S:6 * S]

    def layer_norm(x):
        mu = jnp.mean(x, axis=-1, keepdims=True)
        xc = x - mu
        var = jnp.mean(xc * xc, axis=-1, keepdims=True)
        return xc * lax.rsqrt(var + eps) * gamma + beta

    out_hist_ref[...] = layer_norm(c_utt2his + c_resp2hist).astype(out_hist_ref.dtype)
    out_resp_ref[...] = layer_norm(c_utt2resp + c_his2resp).astype(out_resp_ref.dtype)
    out_utt_ref[...] = layer_norm(c_resp2utt + c_his2utt).astype(out_utt_ref.dtype)


def _vmem_bytes_per_step(bt, S, D):
    """Rough per-grid-step VMEM footprint (bytes) used to budget the batch tile."""
    io = 3 * bt * S * D * 4 * 2 * 2          # 3 inputs + 3 outputs (f32), double-buffered
    consts = 2 * (D * D * 2 + 3 * D * 4)     # bf16 weight + packed (3, D) vectors
    q_scores = 3 * bt * 2 * S * (D + S) * 4  # stacked queries + score/prob matrices (f32)
    ctx = 6 * bt * S * D * 4 * 2             # six live contexts (+ headroom for bf16 copies / FF out)
    return io + consts + q_scores + ctx


def _pick_batch_block(B, S, D, budget_bytes=40 * 1024 * 1024):
    """Largest divisor Bt of B fitting the VMEM budget, keeping >= 2 grid steps
    (so ("parallel",) dimension semantics can split work across v7x's two
    TensorCores), preferring an even step count."""
    candidates = []
    for bt in range(1, B + 1):
        if B % bt:
            continue
        steps = B // bt
        if B >= 2 and steps < 2:
            continue
        if bt > 1 and _vmem_bytes_per_step(bt, S, D) > budget_bytes:
            continue
        candidates.append(bt)
    if not candidates:
        return 1
    even = [bt for bt in candidates if (B // bt) % 2 == 0]
    return max(even) if even else max(candidates)


def triple_attention(history, utterance, response, params):
    """history/utterance/response: (B, S, D). Returns (ctx_hist, ctx_resp, ctx_utt)."""
    B, S, D = history.shape
    assert utterance.shape == (B, S, D) and response.shape == (B, S, D), \
        "the module's residual sums require matching shapes"
    scale = float(D) ** -0.5
    eps = 1e-5

    # PyTorch Linear: y = x @ W.T + b with W (out, in) -> pre-transpose once and store
    # in bf16 (MXU-native operand dtype; accumulation stays f32 inside the kernel).
    w = jnp.transpose(params["ff_w"]).astype(jnp.bfloat16)               # (D, D)
    # Fold the three per-feature vectors into one (3, D) input (single tiny DMA).
    packed = jnp.stack([params["ff_b"], params["ln_gamma"], params["ln_beta"]],
                       axis=0).astype(jnp.float32)                       # (3, D)

    bt = _pick_batch_block(B, S, D)
    grid = (B // bt,)
    # TODO(synk): for very long sequences where even Bt=1 exceeds the VMEM budget, a
    # query-tile grid axis with online softmax over K would be required.

    seq_spec = pl.BlockSpec((bt, S, D), lambda b: (b, 0, 0))
    out_shape = jax.ShapeDtypeStruct((B, S, D), jnp.float32)

    est = _vmem_bytes_per_step(bt, S, D)
    vmem_limit = int(min(48 * 1024 * 1024, max(32 * 1024 * 1024, 2 * est)))

    # Advisory cost hint so XLA can overlap neighbouring ops with the custom call.
    cost = pl.CostEstimate(
        flops=B * (24 * S * S * D + 12 * S * D * D),
        transcendentals=B * 6 * S * S,
        bytes_accessed=6 * B * S * D * 4 + D * D * 2 + 3 * D * 4)

    kernel = functools.partial(_triple_attention_kernel, scale, eps)
    # TODO(synk): for D < 128 the output stores remain lane-sparse (masked); packing
    # outputs as (B, 1, S*D) slabs would need an in-kernel lane<->sublane reshape.
    return pl.pallas_call(
        kernel,
        out_shape=(out_shape, out_shape, out_shape),
        grid=grid,
        in_specs=[
            seq_spec, seq_spec, seq_spec,                                # history, utterance, response
            pl.BlockSpec((D, D), lambda b: (0, 0)),                      # FF weight (grid-invariant)
            pl.BlockSpec((3, D), lambda b: (0, 0)),                      # bias / gamma / beta (grid-invariant)
        ],
        out_specs=(seq_spec, seq_spec, seq_spec),
        compiler_params=pltpu.CompilerParams(
            dimension_semantics=("parallel",),
            vmem_limit_bytes=vmem_limit),
        cost_estimate=cost,
    )(history, utterance, response, w, packed)


def triple_attention_ref(history, utterance, response, params, matmul_dtype=jnp.float32):
    """Pure-JAX reference (eval-mode dropout). `matmul_dtype=jnp.bfloat16` mirrors the
    kernel's bf16 matmul operands (f32 accumulation) for tight validation."""
    D = history.shape[-1]
    scale = float(D) ** -0.5
    eps = 1e-5
    W, b = params["ff_w"], params["ff_b"]
    g, beta = params["ln_gamma"], params["ln_beta"]
    md = matmul_dtype

    def attn(q, k, v):
        s = jnp.einsum("bqd,bkd->bqk", (q * scale).astype(md), k.astype(md),
                       preferred_element_type=jnp.float32)
        p = jax.nn.softmax(s, axis=-1)
        return jnp.einsum("bqk,bkd->bqd", p.astype(md), v.astype(md),
                          preferred_element_type=jnp.float32)

    def ff(x):
        y = jnp.einsum("bsd,od->bso", x.astype(md), W.astype(md),
                       preferred_element_type=jnp.float32) + b
        return jax.nn.relu(y)

    def ln(x):
        mu = jnp.mean(x, axis=-1, keepdims=True)
        var = jnp.mean((x - mu) ** 2, axis=-1, keepdims=True)
        return (x - mu) / jnp.sqrt(var + eps) * g + beta

    c_his2utt = ff(attn(utterance, history, history))
    c_utt2his = ff(attn(history, utterance, utterance))
    c_his2resp = ff(attn(response, history, history))
    c_resp2hist = ff(attn(history, response, response))
    c_utt2resp = ff(attn(utterance, response, response))
    c_resp2utt = ff(attn(response, utterance, utterance))

    return (ln(c_utt2his + c_resp2hist),
            ln(c_utt2resp + c_his2resp),
            ln(c_resp2utt + c_his2utt))


if __name__ == "__main__":
    B, S, D = 2, 8, 32
    key = jax.random.PRNGKey(0)
    ks = jax.random.split(key, 7)

    history = jax.random.normal(ks[0], (B, S, D), jnp.float32)
    utterance = jax.random.normal(ks[1], (B, S, D), jnp.float32)
    response = jax.random.normal(ks[2], (B, S, D), jnp.float32)
    params = {
        "ff_w": 0.2 * jax.random.normal(ks[3], (D, D), jnp.float32),     # PyTorch Linear weight (out, in)
        "ff_b": 0.1 * jax.random.normal(ks[4], (D,), jnp.float32),
        "ln_gamma": 1.0 + 0.1 * jax.random.normal(ks[5], (D,), jnp.float32),
        "ln_beta": 0.1 * jax.random.normal(ks[6], (D,), jnp.float32),
    }

    outs = jax.block_until_ready(triple_attention(history, utterance, response, params))
    # Reference mirrors the kernel's bf16 matmul operands (f32 accumulation); the
    # tolerance absorbs pl.reciprocal(approx=True) and accumulation-order differences.
    refs = triple_attention_ref(history, utterance, response, params,
                                matmul_dtype=jnp.bfloat16)

    for o, rf in zip(outs, refs):
        assert o.shape == (B, S, D), o.shape
        max_err = float(jnp.max(jnp.abs(o - rf)))
        assert jnp.allclose(o, rf, atol=5e-2, rtol=5e-2), f"max_err={max_err}"
    print("KERNEL_OK")
</pallas_src>

<mosaic_0001>
module attributes {stable_mosaic.version = 11 : i64} {
  func.func @_triple_attention_kernel(%arg0: i32, %arg1: memref<1x8x32xf32, #tpu.memory_space<vmem>>, %arg2: memref<1x8x32xf32, #tpu.memory_space<vmem>>, %arg3: memref<1x8x32xf32, #tpu.memory_space<vmem>>, %arg4: memref<32x32xbf16, #tpu.memory_space<vmem>>, %arg5: memref<3x32xf32, #tpu.memory_space<vmem>>, %arg6: memref<1x8x32xf32, #tpu.memory_space<vmem>>, %arg7: memref<1x8x32xf32, #tpu.memory_space<vmem>>, %arg8: memref<1x8x32xf32, #tpu.memory_space<vmem>>) attributes {dimension_semantics = [#tpu.dimension_semantics<parallel>], iteration_bounds = array<i64: 2>, scalar_prefetch = 0 : i64, scratch_operands = 0 : i64, tpu.core_type = #tpu.core_type<tc>, window_params = [{transform_indices = @transform_0, window_bounds = array<i64: 1, 8, 32>}, {transform_indices = @transform_1, window_bounds = array<i64: 1, 8, 32>}, {transform_indices = @transform_2, window_bounds = array<i64: 1, 8, 32>}, {pipeline_mode = #tpu.pipeline_mode<synchronous>, transform_indices = @transform_3, window_bounds = array<i64: 32, 32>}, {pipeline_mode = #tpu.pipeline_mode<synchronous>, transform_indices = @transform_4, window_bounds = array<i64: 3, 32>}, {transform_indices = @transform_5, window_bounds = array<i64: 1, 8, 32>}, {transform_indices = @transform_6, window_bounds = array<i64: 1, 8, 32>}, {transform_indices = @transform_7, window_bounds = array<i64: 1, 8, 32>}]} {
    %c0 = arith.constant 0 : index
    %c0_0 = arith.constant 0 : index
    %c0_1 = arith.constant 0 : index
    %0 = vector.load %arg1[%c0, %c0_0, %c0_1] : memref<1x8x32xf32, #tpu.memory_space<vmem>>, vector<1x8x32xf32>
    %c0_2 = arith.constant 0 : index
    %c0_3 = arith.constant 0 : index
    %c0_4 = arith.constant 0 : index
    %1 = vector.load %arg2[%c0_2, %c0_3, %c0_4] : memref<1x8x32xf32, #tpu.memory_space<vmem>>, vector<1x8x32xf32>
    %c0_5 = arith.constant 0 : index
    %c0_6 = arith.constant 0 : index
    %c0_7 = arith.constant 0 : index
    %2 = vector.load %arg3[%c0_5, %c0_6, %c0_7] : memref<1x8x32xf32, #tpu.memory_space<vmem>>, vector<1x8x32xf32>
    %c0_8 = arith.constant 0 : index
    %c0_9 = arith.constant 0 : index
    %3 = vector.load %arg4[%c0_8, %c0_9] : memref<32x32xbf16, #tpu.memory_space<vmem>>, vector<32x32xbf16>
    %c0_10 = arith.constant 0 : index
    %c0_11 = arith.constant 0 : index
    %4 = vector.load %arg5[%c0_10, %c0_11] : memref<3x32xf32, #tpu.memory_space<vmem>>, vector<3x32xf32>
    %5 = vector.extract_strided_slice %4 {offsets = [0, 0], sizes = [1, 32], strides = [1, 1]} : vector<3x32xf32> to vector<1x32xf32>
    %6 = vector.extract_strided_slice %4 {offsets = [1, 0], sizes = [1, 32], strides = [1, 1]} : vector<3x32xf32> to vector<1x32xf32>
    %7 = vector.extract_strided_slice %4 {offsets = [2, 0], sizes = [1, 32], strides = [1, 1]} : vector<3x32xf32> to vector<1x32xf32>
    %8 = tpu.concatenate %1, %2 in 1 : vector<1x8x32xf32>, vector<1x8x32xf32> -> vector<1x16x32xf32>
    %cst = arith.constant 0.176776692 : f32
    %9 = vector.broadcast %cst : f32 to vector<1x16x32xf32>
    %10 = arith.mulf %8, %9 : vector<1x16x32xf32>
    %11 = arith.truncf %10 : vector<1x16x32xf32> to vector<1x16x32xbf16>
    %12 = arith.truncf %0 : vector<1x8x32xf32> to vector<1x8x32xbf16>
    "tpu.trace_start"() <{level = 10 : i32, message = "bqd,bkd->bqk"}> : () -> ()
    %cst_12 = arith.constant dense<0.000000e+00> : vector<1x16x8xf32>
    %13 = tpu.matmul %11, %12, %cst_12 {dimension_numbers = #tpu.dot_dimension_numbers<[2], [2], [1], [1], [0, 0, 0, 1, 1, 1], [0], [0]>} : vector<1x16x32xbf16>, vector<1x8x32xbf16>, vector<1x16x8xf32> -> vector<1x16x8xf32>
    "tpu.trace_stop"() : () -> ()
    %cst_13 = arith.constant dense<0xFF800000> : vector<1x16xf32>
    %14 = vector.multi_reduction <maximumf>, %13, %cst_13 [2] : vector<1x16x8xf32> to vector<1x16xf32>
    %15 = vector.shape_cast %14 : vector<1x16xf32> to vector<1x16x1xf32>
    %16 = vector.broadcast %15 : vector<1x16x1xf32> to vector<1x16x8xf32>
    %17 = arith.subf %13, %16 : vector<1x16x8xf32>
    %18 = math.exp %17 : vector<1x16x8xf32>
    %cst_14 = arith.constant dense<0.000000e+00> : vector<1x16xf32>
    %19 = vector.multi_reduction <add>, %18, %cst_14 [2] : vector<1x16x8xf32> to vector<1x16xf32>
    %20 = vector.shape_cast %19 : vector<1x16xf32> to vector<1x16x1xf32>
    %21 = tpu.reciprocal %20 {approx = true} : vector<1x16x1xf32> -> vector<1x16x1xf32>
    %22 = vector.broadcast %21 : vector<1x16x1xf32> to vector<1x16x8xf32>
    %23 = arith.mulf %18, %22 : vector<1x16x8xf32>
    %24 = arith.truncf %23 : vector<1x16x8xf32> to vector<1x16x8xbf16>
    "tpu.trace_start"() <{level = 10 : i32, message = "bqk,bkd->bqd"}> : () -> ()
    %cst_15 = arith.constant dense<0.000000e+00> : vector<1x16x32xf32>
    %25 = tpu.matmul %24, %12, %cst_15 {dimension_numbers = #tpu.dot_dimension_numbers<[2], [1], [1], [2], [0, 0, 0, 1, 1, 2], [0], [0]>} : vector<1x16x8xbf16>, vector<1x8x32xbf16>, vector<1x16x32xf32> -> vector<1x16x32xf32>
    "tpu.trace_stop"() : () -> ()
    %26 = tpu.concatenate %0, %2 in 1 : vector<1x8x32xf32>, vector<1x8x32xf32> -> vector<1x16x32xf32>
    %cst_16 = arith.constant 0.176776692 : f32
    %27 = vector.broadcast %cst_16 : f32 to vector<1x16x32xf32>
    %28 = arith.mulf %26, %27 : vector<1x16x32xf32>
    %29 = arith.truncf %28 : vector<1x16x32xf32> to vector<1x16x32xbf16>
    %30 = arith.truncf %1 : vector<1x8x32xf32> to vector<1x8x32xbf16>
    "tpu.trace_start"() <{level = 10 : i32, message = "bqd,bkd->bqk"}> : () -> ()
    %cst_17 = arith.constant dense<0.000000e+00> : vector<1x16x8xf32>
    %31 = tpu.matmul %29, %30, %cst_17 {dimension_numbers = #tpu.dot_dimension_numbers<[2], [2], [1], [1], [0, 0, 0, 1, 1, 1], [0], [0]>} : vector<1x16x32xbf16>, vector<1x8x32xbf16>, vector<1x16x8xf32> -> vector<1x16x8xf32>
    "tpu.trace_stop"() : () -> ()
    %cst_18 = arith.constant dense<0xFF800000> : vector<1x16xf32>
    %32 = vector.multi_reduction <maximumf>, %31, %cst_18 [2] : vector<1x16x8xf32> to vector<1x16xf32>
    %33 = vector.shape_cast %32 : vector<1x16xf32> to vector<1x16x1xf32>
    %34 = vector.broadcast %33 : vector<1x16x1xf32> to vector<1x16x8xf32>
    %35 = arith.subf %31, %34 : vector<1x16x8xf32>
    %36 = math.exp %35 : vector<1x16x8xf32>
    %cst_19 = arith.constant dense<0.000000e+00> : vector<1x16xf32>
    %37 = vector.multi_reduction <add>, %36, %cst_19 [2] : vector<1x16x8xf32> to vector<1x16xf32>
    %38 = vector.shape_cast %37 : vector<1x16xf32> to vector<1x16x1xf32>
    %39 = tpu.reciprocal %38 {approx = true} : vector<1x16x1xf32> -> vector<1x16x1xf32>
    %40 = vector.broadcast %39 : vector<1x16x1xf32> to vector<1x16x8xf32>
    %41 = arith.mulf %36, %40 : vector<1x16x8xf32>
    %42 = arith.truncf %41 : vector<1x16x8xf32> to vector<1x16x8xbf16>
    "tpu.trace_start"() <{level = 10 : i32, message = "bqk,bkd->bqd"}> : () -> ()
    %cst_20 = arith.constant dense<0.000000e+00> : vector<1x16x32xf32>
    %43 = tpu.matmul %42, %30, %cst_20 {dimension_numbers = #tpu.dot_dimension_numbers<[2], [1], [1], [2], [0, 0, 0, 1, 1, 2], [0], [0]>} : vector<1x16x8xbf16>, vector<1x8x32xbf16>, vector<1x16x32xf32> -> vector<1x16x32xf32>
    "tpu.trace_stop"() : () -> ()
    %44 = tpu.concatenate %0, %1 in 1 : vector<1x8x32xf32>, vector<1x8x32xf32> -> vector<1x16x32xf32>
    %cst_21 = arith.constant 0.176776692 : f32
    %45 = vector.broadcast %cst_21 : f32 to vector<1x16x32xf32>
    %46 = arith.mulf %44, %45 : vector<1x16x32xf32>
    %47 = arith.truncf %46 : vector<1x16x32xf32> to vector<1x16x32xbf16>
    %48 = arith.truncf %2 : vector<1x8x32xf32> to vector<1x8x32xbf16>
    "tpu.trace_start"() <{level = 10 : i32, message = "bqd,bkd->bqk"}> : () -> ()
    %cst_22 = arith.constant dense<0.000000e+00> : vector<1x16x8xf32>
    %49 = tpu.matmul %47, %48, %cst_22 {dimension_numbers = #tpu.dot_dimension_numbers<[2], [2], [1], [1], [0, 0, 0, 1, 1, 1], [0], [0]>} : vector<1x16x32xbf16>, vector<1x8x32xbf16>, vector<1x16x8xf32> -> vector<1x16x8xf32>
    "tpu.trace_stop"() : () -> ()
    %cst_23 = arith.constant dense<0xFF800000> : vector<1x16xf32>
    %50 = vector.multi_reduction <maximumf>, %49, %cst_23 [2] : vector<1x16x8xf32> to vector<1x16xf32>
    %51 = vector.shape_cast %50 : vector<1x16xf32> to vector<1x16x1xf32>
    %52 = vector.broadcast %51 : vector<1x16x1xf32> to vector<1x16x8xf32>
    %53 = arith.subf %49, %52 : vector<1x16x8xf32>
    %54 = math.exp %53 : vector<1x16x8xf32>
    %cst_24 = arith.constant dense<0.000000e+00> : vector<1x16xf32>
    %55 = vector.multi_reduction <add>, %54, %cst_24 [2] : vector<1x16x8xf32> to vector<1x16xf32>
    %56 = vector.shape_cast %55 : vector<1x16xf32> to vector<1x16x1xf32>
    %57 = tpu.reciprocal %56 {approx = true} : vector<1x16x1xf32> -> vector<1x16x1xf32>
    %58 = vector.broadcast %57 : vector<1x16x1xf32> to vector<1x16x8xf32>
    %59 = arith.mulf %54, %58 : vector<1x16x8xf32>
    %60 = arith.truncf %59 : vector<1x16x8xf32> to vector<1x16x8xbf16>
    "tpu.trace_start"() <{level = 10 : i32, message = "bqk,bkd->bqd"}> : () -> ()
    %cst_25 = arith.constant dense<0.000000e+00> : vector<1x16x32xf32>
    %61 = tpu.matmul %60, %48, %cst_25 {dimension_numbers = #tpu.dot_dimension_numbers<[2], [1], [1], [2], [0, 0, 0, 1, 1, 2], [0], [0]>} : vector<1x16x8xbf16>, vector<1x8x32xbf16>, vector<1x16x32xf32> -> vector<1x16x32xf32>
    "tpu.trace_stop"() : () -> ()
    %62 = tpu.concatenate %25, %43, %61 in 1 : vector<1x16x32xf32>, vector<1x16x32xf32>, vector<1x16x32xf32> -> vector<1x48x32xf32>
    %63 = vector.shape_cast %62 : vector<1x48x32xf32> to vector<48x32xf32>
    %64 = arith.truncf %63 : vector<48x32xf32> to vector<48x32xbf16>
    %cst_26 = arith.constant dense<0.000000e+00> : vector<48x32xf32>
    %65 = tpu.matmul %64, %3, %cst_26 {dimension_numbers = #tpu.dot_dimension_numbers<[1], [0], [0], [1], [0, 0, 1, 1], [], []>} : vector<48x32xbf16>, vector<32x32xbf16>, vector<48x32xf32> -> vector<48x32xf32>
    %66 = vector.broadcast %5 : vector<1x32xf32> to vector<48x32xf32>
    %67 = arith.addf %65, %66 : vector<48x32xf32>
    %cst_27 = arith.constant 0.000000e+00 : f32
    %68 = vector.broadcast %cst_27 : f32 to vector<48x32xf32>
    %69 = arith.maximumf %67, %68 : vector<48x32xf32>
    %70 = vector.shape_cast %69 : vector<48x32xf32> to vector<1x48x32xf32>
    %71 = vector.extract_strided_slice %70 {offsets = [0, 0, 0], sizes = [1, 8, 32], strides = [1, 1, 1]} : vector<1x48x32xf32> to vector<1x8x32xf32>
    %72 = vector.extract_strided_slice %70 {offsets = [0, 8, 0], sizes = [1, 8, 32], strides = [1, 1, 1]} : vector<1x48x32xf32> to vector<1x8x32xf32>
    %73 = vector.extract_strided_slice %70 {offsets = [0, 16, 0], sizes = [1, 8, 32], strides = [1, 1, 1]} : vector<1x48x32xf32> to vector<1x8x32xf32>
    %74 = vector.extract_strided_slice %70 {offsets = [0, 24, 0], sizes = [1, 8, 32], strides = [1, 1, 1]} : vector<1x48x32xf32> to vector<1x8x32xf32>
    %75 = vector.extract_strided_slice %70 {offsets = [0, 32, 0], sizes = [1, 8, 32], strides = [1, 1, 1]} : vector<1x48x32xf32> to vector<1x8x32xf32>
    %76 = vector.extract_strided_slice %70 {offsets = [0, 40, 0], sizes = [1, 8, 32], strides = [1, 1, 1]} : vector<1x48x32xf32> to vector<1x8x32xf32>
    %77 = arith.addf %73, %75 : vector<1x8x32xf32>
    %cst_28 = arith.constant dense<0.000000e+00> : vector<1x8xf32>
    %78 = vector.multi_reduction <add>, %77, %cst_28 [2] : vector<1x8x32xf32> to vector<1x8xf32>
    %79 = vector.shape_cast %78 : vector<1x8xf32> to vector<1x8x1xf32>
    %cst_29 = arith.constant 3.200000e+01 : f32
    %80 = vector.broadcast %cst_29 : f32 to vector<1x8x1xf32>
    %81 = arith.divf %79, %80 : vector<1x8x1xf32>
    %82 = vector.broadcast %81 : vector<1x8x1xf32> to vector<1x8x32xf32>
    %83 = arith.subf %77, %82 : vector<1x8x32xf32>
    %84 = arith.mulf %83, %83 : vector<1x8x32xf32>
    %cst_30 = arith.constant dense<0.000000e+00> : vector<1x8xf32>
    %85 = vector.multi_reduction <add>, %84, %cst_30 [2] : vector<1x8x32xf32> to vector<1x8xf32>
    %86 = vector.shape_cast %85 : vector<1x8xf32> to vector<1x8x1xf32>
    %cst_31 = arith.constant 3.200000e+01 : f32
    %87 = vector.broadcast %cst_31 : f32 to vector<1x8x1xf32>
    %88 = arith.divf %86, %87 : vector<1x8x1xf32>
    %cst_32 = arith.constant 9.99999974E-6 : f32
    %89 = vector.broadcast %cst_32 : f32 to vector<1x8x1xf32>
    %90 = arith.addf %88, %89 : vector<1x8x1xf32>
    %91 = math.rsqrt %90 : vector<1x8x1xf32>
    %92 = vector.broadcast %91 : vector<1x8x1xf32> to vector<1x8x32xf32>
    %93 = arith.mulf %83, %92 : vector<1x8x32xf32>
    %94 = vector.shape_cast %6 : vector<1x32xf32> to vector<1x1x32xf32>
    %95 = vector.broadcast %94 : vector<1x1x32xf32> to vector<1x8x32xf32>
    %96 = arith.mulf %93, %95 : vector<1x8x32xf32>
    %97 = vector.shape_cast %7 : vector<1x32xf32> to vector<1x1x32xf32>
    %98 = vector.broadcast %97 : vector<1x1x32xf32> to vector<1x8x32xf32>
    %99 = arith.addf %96, %98 : vector<1x8x32xf32>
    %c0_33 = arith.constant 0 : index
    %c0_34 = arith.constant 0 : index
    %c0_35 = arith.constant 0 : index
    %100 = vector.load %arg6[%c0_33, %c0_34, %c0_35] : memref<1x8x32xf32, #tpu.memory_space<vmem>>, vector<1x8x32xf32>
    tpu.vector_store %arg6[%c0_33, %c0_34, %c0_35], %99 {strides = array<i32>} : memref<1x8x32xf32, #tpu.memory_space<vmem>>, vector<1x8x32xf32>,
    %101 = arith.addf %76, %72 : vector<1x8x32xf32>
    %cst_36 = arith.constant dense<0.000000e+00> : vector<1x8xf32>
    %102 = vector.multi_reduction <add>, %101, %cst_36 [2] : vector<1x8x32xf32> to vector<1x8xf32>
    %103 = vector.shape_cast %102 : vector<1x8xf32> to vector<1x8x1xf32>
    %cst_37 = arith.constant 3.200000e+01 : f32
    %104 = vector.broadcast %cst_37 : f32 to vector<1x8x1xf32>
    %105 = arith.divf %103, %104 : vector<1x8x1xf32>
    %106 = vector.broadcast %105 : vector<1x8x1xf32> to vector<1x8x32xf32>
    %107 = arith.subf %101, %106 : vector<1x8x32xf32>
    %108 = arith.mulf %107, %107 : vector<1x8x32xf32>
    %cst_38 = arith.constant dense<0.000000e+00> : vector<1x8xf32>
    %109 = vector.multi_reduction <add>, %108, %cst_38 [2] : vector<1x8x32xf32> to vector<1x8xf32>
    %110 = vector.shape_cast %109 : vector<1x8xf32> to vector<1x8x1xf32>
    %cst_39 = arith.constant 3.200000e+01 : f32
    %111 = vector.broadcast %cst_39 : f32 to vector<1x8x1xf32>
    %112 = arith.divf %110, %111 : vector<1x8x1xf32>
    %cst_40 = arith.constant 9.99999974E-6 : f32
    %113 = vector.broadcast %cst_40 : f32 to vector<1x8x1xf32>
    %114 = arith.addf %112, %113 : vector<1x8x1xf32>
    %115 = math.rsqrt %114 : vector<1x8x1xf32>
    %116 = vector.broadcast %115 : vector<1x8x1xf32> to vector<1x8x32xf32>
    %117 = arith.mulf %107, %116 : vector<1x8x32xf32>
    %118 = vector.shape_cast %6 : vector<1x32xf32> to vector<1x1x32xf32>
    %119 = vector.broadcast %118 : vector<1x1x32xf32> to vector<1x8x32xf32>
    %120 = arith.mulf %117, %119 : vector<1x8x32xf32>
    %121 = vector.shape_cast %7 : vector<1x32xf32> to vector<1x1x32xf32>
    %122 = vector.broadcast %121 : vector<1x1x32xf32> to vector<1x8x32xf32>
    %123 = arith.addf %120, %122 : vector<1x8x32xf32>
    %c0_41 = arith.constant 0 : index
    %c0_42 = arith.constant 0 : index
    %c0_43 = arith.constant 0 : index
    %124 = vector.load %arg7[%c0_41, %c0_42, %c0_43] : memref<1x8x32xf32, #tpu.memory_space<vmem>>, vector<1x8x32xf32>
    tpu.vector_store %arg7[%c0_41, %c0_42, %c0_43], %123 {strides = array<i32>} : memref<1x8x32xf32, #tpu.memory_space<vmem>>, vector<1x8x32xf32>,
    %125 = arith.addf %74, %71 : vector<1x8x32xf32>
    %cst_44 = arith.constant dense<0.000000e+00> : vector<1x8xf32>
    %126 = vector.multi_reduction <add>, %125, %cst_44 [2] : vector<1x8x32xf32> to vector<1x8xf32>
    %127 = vector.shape_cast %126 : vector<1x8xf32> to vector<1x8x1xf32>
    %cst_45 = arith.constant 3.200000e+01 : f32
    %128 = vector.broadcast %cst_45 : f32 to vector<1x8x1xf32>
    %129 = arith.divf %127, %128 : vector<1x8x1xf32>
    %130 = vector.broadcast %129 : vector<1x8x1xf32> to vector<1x8x32xf32>
    %131 = arith.subf %125, %130 : vector<1x8x32xf32>
    %132 = arith.mulf %131, %131 : vector<1x8x32xf32>
    %cst_46 = arith.constant dense<0.000000e+00> : vector<1x8xf32>
    %133 = vector.multi_reduction <add>, %132, %cst_46 [2] : vector<1x8x32xf32> to vector<1x8xf32>
    %134 = vector.shape_cast %133 : vector<1x8xf32> to vector<1x8x1xf32>
    %cst_47 = arith.constant 3.200000e+01 : f32
    %135 = vector.broadcast %cst_47 : f32 to vector<1x8x1xf32>
    %136 = arith.divf %134, %135 : vector<1x8x1xf32>
    %cst_48 = arith.constant 9.99999974E-6 : f32
    %137 = vector.broadcast %cst_48 : f32 to vector<1x8x1xf32>
    %138 = arith.addf %136, %137 : vector<1x8x1xf32>
    %139 = math.rsqrt %138 : vector<1x8x1xf32>
    %140 = vector.broadcast %139 : vector<1x8x1xf32> to vector<1x8x32xf32>
    %141 = arith.mulf %131, %140 : vector<1x8x32xf32>
    %142 = vector.shape_cast %6 : vector<1x32xf32> to vector<1x1x32xf32>
    %143 = vector.broadcast %142 : vector<1x1x32xf32> to vector<1x8x32xf32>
    %144 = arith.mulf %141, %143 : vector<1x8x32xf32>
    %145 = vector.shape_cast %7 : vector<1x32xf32> to vector<1x1x32xf32>
    %146 = vector.broadcast %145 : vector<1x1x32xf32> to vector<1x8x32xf32>
    %147 = arith.addf %144, %146 : vector<1x8x32xf32>
    %c0_49 = arith.constant 0 : index
    %c0_50 = arith.constant 0 : index
    %c0_51 = arith.constant 0 : index
    %148 = vector.load %arg8[%c0_49, %c0_50, %c0_51] : memref<1x8x32xf32, #tpu.memory_space<vmem>>, vector<1x8x32xf32>
    tpu.vector_store %arg8[%c0_49, %c0_50, %c0_51], %147 {strides = array<i32>} : memref<1x8x32xf32, #tpu.memory_space<vmem>>, vector<1x8x32xf32>,
    return
  }
  func.func @transform_0(%arg0: i32) -> (i32, i32, i32) {
    %c0_i32 = arith.constant 0 : i32
    %c0_i32_0 = arith.constant 0 : i32
    %c0_i32_1 = arith.constant 0 : i32
    return %arg0, %c0_i32, %c0_i32_0 : i32, i32, i32
  }
  func.func @transform_1(%arg0: i32) -> (i32, i32, i32) {
    %c0_i32 = arith.constant 0 : i32
    %c0_i32_0 = arith.constant 0 : i32
    %c0_i32_1 = arith.constant 0 : i32
    return %arg0, %c0_i32, %c0_i32_0 : i32, i32, i32
  }
  func.func @transform_2(%arg0: i32) -> (i32, i32, i32) {
    %c0_i32 = arith.constant 0 : i32
    %c0_i32_0 = arith.constant 0 : i32
    %c0_i32_1 = arith.constant 0 : i32
    return %arg0, %c0_i32, %c0_i32_0 : i32, i32, i32
  }
  func.func @transform_3(%arg0: i32) -> (i32, i32) {
    %c0_i32 = arith.constant 0 : i32
    %c0_i32_0 = arith.constant 0 : i32
    %c0_i32_1 = arith.constant 0 : i32
    return %c0_i32, %c0_i32_0 : i32, i32
  }
  func.func @transform_4(%arg0: i32) -> (i32, i32) {
    %c0_i32 = arith.constant 0 : i32
    %c0_i32_0 = arith.constant 0 : i32
    %c0_i32_1 = arith.constant 0 : i32
    return %c0_i32, %c0_i32_0 : i32, i32
  }
  func.func @transform_5(%arg0: i32) -> (i32, i32, i32) {
    %c0_i32 = arith.constant 0 : i32
    %c0_i32_0 = arith.constant 0 : i32
    %c0_i32_1 = arith.constant 0 : i32
    return %arg0, %c0_i32, %c0_i32_0 : i32, i32, i32
  }
  func.func @transform_6(%arg0: i32) -> (i32, i32, i32) {
    %c0_i32 = arith.constant 0 : i32
    %c0_i32_0 = arith.constant 0 : i32
    %c0_i32_1 = arith.constant 0 : i32
    return %arg0, %c0_i32, %c0_i32_0 : i32, i32, i32
  }
  func.func @transform_7(%arg0: i32) -> (i32, i32, i32) {
    %c0_i32 = arith.constant 0 : i32
    %c0_i32_0 = arith.constant 0 : i32
    %c0_i32_1 = arith.constant 0 : i32
    return %arg0, %c0_i32, %c0_i32_0 : i32, i32, i32
  }
}

</mosaic_0001>

<bundles_post_ra>
// kernel: tpu_custom_call.1
= control target key start
LH: loop header
LB: loop body
LE: loop exit
PB: predicated region body
PF: predicated region fallthrough
CT: control target
= control target key end

     0   :  { %s2137_s0 = inlined_call_operand.hbm [shape: f32[2,8,32], index: 0, kind: input, shape index: {}]   ;;  %s2138_s1 = inlined_call_operand.hbm [shape: f32[2,8,32], index: 1, kind: input, shape index: {}]   ;;  %s2139_s2 = inlined_call_operand.hbm [shape: f32[2,8,32], index: 2, kind: input, shape index: {}]   ;;  %s2140_s3 = inlined_call_operand.hbm [shape: bf16[32,32], index: 3, kind: input, shape index: {}]   ;;  %s2141_s4 = inlined_call_operand.vmem [shape: f32[3,32], index: 4, kind: input, shape index: {}]   ;;  %s2142_s5 = inlined_call_operand.hbm [shape: f32[2,8,32], index: 5, kind: output, shape index: {0}]   ;;  %s2143_s6 = inlined_call_operand.hbm [shape: f32[2,8,32], index: 6, kind: output, shape index: {1}]   ;;  %s2144_s7 = inlined_call_operand.hbm [shape: f32[2,8,32], index: 7, kind: output, shape index: {2}]  }
   0x1   :  { %2165 = sst [smem:[#allocation24_spill]] %s2138_s1 }
   0x2   :  { %2166 = sst [smem:[#allocation25_spill]] %s2142_s5 }
   0x3   :  { %2167 = sst [smem:[#allocation26_spill]] %s2143_s6 }
   0x4   :  { %2168 = sst [smem:[#allocation27_spill]] %s2144_s7 }
   0x5   :  { %13 = vsyncpa [#allocation3], 0 }
   0x6   :  { %15 = vsyncpa [#allocation3 + $0x1], 0 }
   0x7   :  { %16 = vsyncpa [#allocation6], 0 }
   0x8   :  { %18 = vsyncpa [#allocation6 + $0x1], 0 }
   0x9   :  { %19 = vsyncpa [#allocation9], 0 }
   0xa   :  { %20 = vsyncpa [#allocation4], 0 }
   0xb   :  { %22 = vsyncpa [#allocation4 + $0x1], 0 }
   0xc   :  { %23 = vsyncpa [#allocation12], 0 }
   0xd   :  { %25 = vsyncpa [#allocation12 + $0x1], 0  ;;  %s1676_s24 = smov 0   ;;  %s1678_s25 = smov 0  }
   0xe   :  { %s1680_s26 = smov 0   ;;  %s1682_s27 = smov 0  }
   0xf LB: > { %2169 = sst [smem:[#allocation19_spill]] %s1611_s24  ;;  %s1697_s28 = sadd.s32 1, %s1623_s27   ;;  %s1623_s27 = sphi %s1682_s27, %s2201_s27   ;;  %s1619_s26 = sphi %s1680_s26, %s2205_s26   ;;  %s1615_s25 = sphi %s1678_s25, %s2204_s25   ;;  %s1611_s24 = sphi %s1676_s24, %s2203_s24  }
  0x10   : > { %2170 = sst [smem:[#allocation20_spill]] %s1623_s27  ;;  %s38_s29 = sadd.s32 1, %s1619_s26 }
  0x11   : > { %2171 = sst [smem:[#allocation21_spill]] %s1697_s28  ;;  %s35_s30 = ssub.s32 %s1623_s27, %s1697_s28 }
  0x12   : > { %p2145_p0 = scmp.ne.s32.totalorder %s1619_s26, %s1615_s25  ;;  %p36_p1 = scmp.eq.s32.totalorder %s35_s30, 0 }
  0x13   : > { %p46_p2 = scmp.eq.s32.totalorder %s1623_s27, 0  ;;  %p1299_p4 = scmp.lt.s32.totalorder %s1623_s27, 2 }
  0x14   : > { %s1708_s8 = scalar_select %p36_p1, %s1619_s26, %s38_s29  }
  0x15   : > { %p47_p5 = por %p46_p2, %p2145_p0  ;;  %s2147_s9 = sand.u32 1, %s1619_s26  }
  0x16   : > { %2172 = sst [smem:[#allocation22_spill]] %s1708_s8  ;;  %s1716_s10 = sshll.u32 %s2147_s9, 3 }
  0x17   : > { %s1719_s11 = sshll.u32 %s1623_s27, 7  ;;  %p1721_p6 = pnand %p1299_p4, %p47_p5 }
  0x18   : > { %s281_s13 = sand.u32 1, %s1623_s27   ;;  %s2174_s1 = sld [smem:[#allocation24_spill]] }
  0x19   : > { %s2173_s12 = scalar_select %p1721_p6, 1, 0 }
  0x1a   : > { %s285_s17 = scalar_lea.vmem [#allocation5], %s1716_s10  ;;  %s1735_s19 = scalar_lea.sflag [#allocation6], %s281_s13 }
  0x1b   : > { %s292_s18 = sshll.u32 %s285_s17, 4  ;;  %p1741_p8 = pneg %p1721_p6  ;;  %s1733_s18 = int_to_ptr.vmem [resolvable:$true] %s292_s18 }
  0x1d   : > { %s2175_s21 = scalar_select %p1741_p8, 1, 0 }
  0x1e   : > { %s1730_s16 = scalar_lea.hbm %s2174_s1, %s1719_s11  ;;  %s1376_s29 = scalar_lea.hbm %s2174_s1, 256 }
  0x1f   : > { %s1371_s20 = scalar_lea.hbm %s1730_s16, 128  ;;  %p1377_p11 = scmp.lt.u32.totalorder %s1730_s16, %s2174_s1 }
  0x20   : > { %p1372_p7 = scmp.ne.s32.totalorder %s1730_s16, %s1371_s20  ;;  %p1378_p12 = scmp.lt.u32.totalorder %s1376_s29, %s1371_s20 }
  0x21   : > { %p1380_p1 = scmp.lt.u32.totalorder %s1371_s20, %s1730_s16 }
  0x22   : > { %p1374_p9 = pnand %p1741_p8, %p1372_p7  ;;  %p1379_p13 = por %p1378_p12, %p1377_p11 }
  0x24   : > { %p1375_p10 = pneg %p1374_p9  ;;  %p1381_p2 = por %p1380_p1, %p1379_p13 }
  0x26   : > { %p1382_p4 = pnand %p1381_p2, %p1375_p10 }
  0x28   : > { %1385 = shalt.err (!%p1382_p4)
}
  0x29   : > { %s1386_s13 = scalar_lea.vmem %s1733_s18, 128  ;;  %s1625_s15 = smov [#allocation5]  }
  0x2a   : > { %p1387_p5 = scmp.ne.s32.totalorder %s1733_s18, %s1386_s13  ;;  %s1391_s17 = sshll.u32 %s1625_s15, 4  ;;  %s1392_s17 = int_to_ptr.vmem [resolvable:$false] %s1391_s17 }
  0x2b   : > { %s1393_s22 = scalar_lea.vmem %s1392_s17, 256  ;;  %p1394_p3 = scmp.lt.s32.totalorder %s1733_s18, %s1392_s17 }
  0x2c   : > { %p1389_p7 = pnand %p1387_p5, %p1741_p8  ;;  %p1395_p0 = scmp.lt.s32.totalorder %s1393_s22, %s1386_s13 }
  0x2e   : > { %p1390_p9 = pneg %p1389_p7  ;;  %p1396_p11 = por %p1395_p0, %p1394_p3 }
  0x30   : > { %p1397_p12 = pnand %p1396_p11, %p1390_p9 }
  0x32   : > { %1400 = shalt.err (!%p1397_p12)
}
  0x33   : > { %1284 = dma.hbm_to_vmem [thread:$0]  (!%p1721_p6), %s1730_s16, 128, %s1733_s18, %s1735_s19  }
  0x34   : > { %s1766_s20 = sadd.s32 4294967295, %s1623_s27   ;;  %s2146_s23 = sadd.s32 4294967294, %s1623_s27  }
  0x35   : > { %p51_p0 = scmp.ne.s32.totalorder %s1615_s25, %s1611_s24  ;;  %p2155_p3 = scmp.eq.s32.totalorder %s1766_s20, 0 }
  0x36   : > { %p169_p10 = scmp.eq.s32.totalorder %s1766_s20, 1  ;;  %p175_p13 = scmp.eq.s32.totalorder %s2146_s23, 1 }
  0x37   : > { %p1777_p1 = por %p2155_p3, %p51_p0  ;;  %p1153_p2 = scmp.ge.s32.totalorder %s1623_s27, 1 }
  0x38   : > { %p2177_p4 = scmp.ne.s32.totalorder %s1619_s26, %s1615_s25  ;;  %p1789_p7 = por %p175_p13, %p51_p0 }
  0x39   : > { %s2176_s29 = scalar_select %p1777_p1, 1, 0 }
  0x3a   : > { %p1785_p5 = por %p169_p10, %p2177_p4  ;;  %p234_p9 = scmp.lt.s32.totalorder %s1623_s27, 3 }
  0x3b   : > { %s2179_s18 = scalar_select %p1789_p7, 1, 0 }
  0x3c   : > { %s2178_s16 = scalar_select %p1785_p5, 1, 0 }
  0x3d   : > { %2180 = sst [smem:[#allocation23_spill]] %s2179_s18  ;;  %p1794_p11 = pnand %p1153_p2, %p234_p9 }
  0x3e   : > { %s1626_s14 = smov [#allocation8]   ;;  %s1806_s22 = scalar_lea.hbm %s2137_s0, %s1719_s11 }
  0x3f   : > { %s2181_s30 = scalar_select %p1794_p11, 1, 0 }
  0x40   : > { %s246_s13 = sshll.u32 %s1626_s14, 4  ;;  %p1274_p12 = pneg %p1794_p11  ;;  %s1798_s13 = int_to_ptr.vmem [resolvable:$true] %s246_s13 }
  0x41   : > { %s267_s9 = scalar_lea.vmem [#allocation2], %s1716_s10  ;;  %s1821_s28 = scalar_lea.hbm %s2139_s2, %s1719_s11 }
  0x42   : > { %p1810_p0 = pnand %p1274_p12, %p2155_p3  ;;  %s274_s1 = sshll.u32 %s267_s9, 4  ;;  %s1815_s1 = int_to_ptr.vmem [resolvable:$true] %s274_s1 }
  0x43   : > { %s1401_s15 = scalar_lea.hbm %s2140_s3, 256 }
  0x44   : > { %p1402_p10 = scmp.ne.s32.totalorder %s2140_s3, %s1401_s15  ;;  %p1403_p13 = pneg %p1810_p0 }
  0x45   : > { %p1408_p9 = scmp.lt.u32.totalorder %s1401_s15, %s2140_s3 }
  0x46   : > { %p1404_p2 = pnand %p1403_p13, %p1402_p10 }
  0x48   : > { %p1405_p4 = pneg %p1404_p2 }
  0x4a   : > { %p1410_p12 = pnand %p1408_p9, %p1405_p4 }
  0x4c   : > { %1413 = shalt.err (!%p1410_p12)
}
  0x4d   : > { %s1414_s8 = scalar_lea.vmem %s1798_s13, 256  ;;  %p1422_p1 = scmp.lt.s32.totalorder %s1798_s13, %s1798_s13 }
  0x4e   : > { %p1415_p3 = scmp.ne.s32.totalorder %s1798_s13, %s1414_s8  ;;  %p1423_p11 = scmp.lt.s32.totalorder %s1414_s8, %s1414_s8 }
  0x50   : > { %p1417_p7 = pnand %p1415_p3, %p1403_p13  ;;  %p1424_p6 = por %p1423_p11, %p1422_p1 }
  0x52   : > { %p1418_p5 = pneg %p1417_p7 }
  0x54   : > { %p1425_p8 = pnand %p1424_p6, %p1418_p5 }
  0x56   : > { %1428 = shalt.err (!%p1425_p8)
}
  0x57   : > { %s1627_s24 = smov 64   ;;  %s1628_s7 = smov 4  }
  0x58   : > { %1277 = dma.hbm_to_vmem [thread:$0]  (!%p1810_p0), %s2140_s3, 256, %s1798_s13, [#allocation9], %s1627_s24, %s1627_s24, %s1628_s7  }
  0x59   : > { %s2183_s18 = sand.u32 1, %s1619_s26   ;;  %s1429_s15 = scalar_lea.hbm %s1806_s22, 128 }
  0x5a   : > { %s264_s14 = scalar_lea.sflag [#allocation3], %s2183_s18  ;;  %p1430_p6 = scmp.ne.s32.totalorder %s1806_s22, %s1429_s15 }
  0x5b   : > { %p2184_p8 = scmp.ne.s32.totalorder %s2175_s21, 0  ;;  %s1434_s8 = scalar_lea.hbm %s2137_s0, 256 }
  0x5c   : > { %p1435_p5 = scmp.lt.u32.totalorder %s1806_s22, %s2137_s0  ;;  %p1436_p7 = scmp.lt.u32.totalorder %s1434_s8, %s1429_s15 }
  0x5d   : > { %p1432_p3 = pnand %p1430_p6, %p2184_p8  ;;  %p1438_p10 = scmp.lt.u32.totalorder %s1429_s15, %s1806_s22 }
  0x5e   : > { %p1437_p11 = por %p1436_p7, %p1435_p5 }
  0x5f   : > { %p1433_p1 = pneg %p1432_p3 }
  0x60   : > { %p1439_p13 = por %p1438_p10, %p1437_p11 }
  0x62   : > { %p1440_p0 = pnand %p1439_p13, %p1433_p1 }
  0x64   : > { %1443 = shalt.err (!%p1440_p0)
}
  0x65   : > { %s1444_s23 = scalar_lea.vmem %s1815_s1, 128  ;;  %s1629_s13 = smov [#allocation2]  }
  0x66   : > { %p1445_p2 = scmp.ne.s32.totalorder %s1815_s1, %s1444_s23  ;;  %s1449_s24 = sshll.u32 %s1629_s13, 4  ;;  %s1450_s24 = int_to_ptr.vmem [resolvable:$false] %s1449_s24 }
  0x67   : > { %s1451_s5 = scalar_lea.vmem %s1450_s24, 256  ;;  %p1452_p12 = scmp.lt.s32.totalorder %s1815_s1, %s1450_s24 }
  0x68   : > { %p1447_p4 = pnand %p1445_p2, %p2184_p8  ;;  %p1453_p6 = scmp.lt.s32.totalorder %s1451_s5, %s1444_s23 }
  0x6a   : > { %p1448_p9 = pneg %p1447_p4  ;;  %p1454_p3 = por %p1453_p6, %p1452_p12 }
  0x6c   : > { %p1455_p5 = pnand %p1454_p3, %p1448_p9 }
  0x6e   : > { %1458 = shalt.err (!%p1455_p5)
}
  0x6f   : > { %p2185_p1 = scmp.ne.s32.totalorder %s2173_s12, 0  ;;  %s303_s6 = scalar_lea.vmem [#allocation7], %s1716_s10 }
  0x70   : > { %s310_s7 = sshll.u32 %s303_s6, 4  ;;  %s1459_s27 = scalar_lea.hbm %s1821_s28, 128  ;;  %s311_s7 = int_to_ptr.vmem [resolvable:$true] %s310_s7 }
  0x71   : > { %1281 = dma.hbm_to_vmem [thread:$0]  (!%p2185_p1), %s1806_s22, 128, %s1815_s1, %s264_s14  }
  0x72   : > { %p1460_p7 = scmp.ne.s32.totalorder %s1821_s28, %s1459_s27  ;;  %s1464_s15 = scalar_lea.hbm %s2139_s2, 256 }
  0x73   : > { %p1465_p13 = scmp.lt.u32.totalorder %s1821_s28, %s2139_s2  ;;  %p1466_p0 = scmp.lt.u32.totalorder %s1464_s15, %s1459_s27 }
  0x74   : > { %p1462_p11 = pnand %p1460_p7, %p2184_p8  ;;  %p1468_p4 = scmp.lt.u32.totalorder %s1459_s27, %s1821_s28 }
  0x75   : > { %p1467_p2 = por %p1466_p0, %p1465_p13 }
  0x76   : > { %p1463_p10 = pneg %p1462_p11 }
  0x77   : > { %p1469_p9 = por %p1468_p4, %p1467_p2 }
  0x79   : > { %p1470_p12 = pnand %p1469_p9, %p1463_p10 }
  0x7b   : > { %1473 = shalt.err (!%p1470_p12)
}
  0x7c   : > { %s1474_s1 = scalar_lea.vmem %s311_s7, 128  ;;  %s1630_s10 = smov [#allocation7]  }
  0x7d   : > { %p1475_p6 = scmp.ne.s32.totalorder %s311_s7, %s1474_s1  ;;  %s1479_s22 = sshll.u32 %s1630_s10, 4  ;;  %s1480_s22 = int_to_ptr.vmem [resolvable:$false] %s1479_s22 }
  0x7e   : > { %s1481_s14 = scalar_lea.vmem %s1480_s22, 256  ;;  %p1482_p7 = scmp.lt.s32.totalorder %s311_s7, %s1480_s22 }
  0x7f   : > { %p1477_p3 = pnand %p1475_p6, %p2184_p8  ;;  %p1483_p11 = scmp.lt.s32.totalorder %s1481_s14, %s1474_s1 }
  0x81   : > { %p1478_p5 = pneg %p1477_p3  ;;  %p1484_p1 = por %p1483_p11, %p1482_p7 }
  0x83   : > { %p1485_p0 = pnand %p1484_p1, %p1478_p5 }
  0x85   : > { %1488 = shalt.err (!%p1485_p0)
}
  0x86   : > { %p2186_p13 = scmp.ne.s32.totalorder %s2173_s12, 0  ;;  %p2187_p10 = scmp.ne.s32.totalorder %s2181_s30, 0 }
  0x87   : > { %s1889_s21 = sand.u32 (!%p2187_p10), 1, %s1615_s25   ;;  %p2188_p8 = scmp.ne.s32.totalorder (!%p2187_p10), %s2176_s29, 0 }
  0x88   : > { %1287 = dma.hbm_to_vmem [thread:$0]  (!%p2186_p13), %s1821_s28, 128, %s311_s7, %s1735_s19  }
  0x89   : > { %319 = sbr.rel (%p2187_p10) target bundleno = 2039 (0x7f7), region = 40  ;;  %s1892_s8 = sshll.u32 (!%p2187_p10), %s1889_s21, 3 }
  0x8a   : > { %s322_s23 = scalar_lea.sflag (!%p2187_p10), [#allocation3], %s1889_s21  ;;  %s325_s13 = scalar_lea.vmem (!%p2187_p10), [#allocation2], %s1892_s8 }
  0x90   : > { %1590 = dma.done.wait (%p2188_p8), %s322_s23, 128  }
  0x91   : > { %1592 = vsyncadd (%p2188_p8), %s322_s23, 4294967168  ;;  %s330_s28 = sand.u32 1, %s1766_s20   ;;  %s334_s19 = scalar_lea.vmem [#allocation5], %s1892_s8 }
  0x92   : > { %s331_s12 = scalar_lea.sflag [#allocation6], %s330_s28 }
  0x93   : > { %1594 = dma.done.wait (%p2188_p8), %s331_s12, 256  }
  0x94   : > { %1596 = vsyncadd (%p2188_p8), %s331_s12, 4294967040  ;;  %s343_s30 = scalar_lea.vmem [#allocation7], %s1892_s8  ;;  %p2189_p1 = scmp.eq.s32.totalorder %s1766_s20, 0 }
  0x96   : > { %1598 = dma.done.wait (%p2189_p1), [#allocation9], 256   ;;  %p2190_p2 = pmov %p2189_p1 }
  0x97   : > { %v1631_v0 = vmov 0.0   ;;  %vm1632_vm0 = vmmov 0   ;;  %v399_v1 = vld [vmem:[%s325_s13] sm:$0xff]  ;;  %v400_v2 = vld [vmem:[%s334_s19] sm:$0xff]  ;;  %vm411_vm1 = vcmask 261120   ;;  %vm459_vm2 = vcmask 64512  }
  0x98   : > { %1600 = vsyncadd (%p2190_p2), [#allocation9], 4294967040  ;;  %1206 = vmatprep.subr.bf16.mxu0 %v1631_v0  ;;  %1208 = vmatprep.mubr.msk.bf16.mxu0 %vm1632_vm0, %v1631_v0  ;;  %v401_v3 = vld [vmem:[%s343_s30] sm:$0xff]  ;;  %v1919_v4 = vmul.f32 0.17677669, %v400_v2  ;;  %v410_v6 = vpack.c.bf16 %v399_v1, %v399_v1  ;;  %v1934_v18 = vpack.c.bf16 %v400_v2, %v400_v2  ;;  %vm486_vm3 = vcmask 1043456  }
  0x99   : > { %1212 = vmatprep.subr.bf16.mxu1 %v1631_v0  ;;  %1214 = vmatprep.mubr.msk.bf16.mxu1 %vm1632_vm0, %v1631_v0  ;;  %v408_v5 = vmul.f32 0.17677669, %v401_v3  ;;  %v1921_v7 = vmul.f32 0.17677669, %v399_v1  ;;  %v1948_v40 = vpack.c.bf16 %v401_v3, %v401_v3  ;;  %v1339_v46 = vld [vmem:[#allocation8] sm:$0xff]   ;;  %v1340_v47 = vld [vmem:[#allocation8 + $0x8] sm:$0xff]  }
  0x9a   : > { %v416_v8 = vsel %vm411_vm1, %v410_v6, 0  ;;  %v537_v19 = vsel %vm411_vm1, %v1934_v18, 0  ;;  %v487_v30 = vsel %vm486_vm3, %v410_v6, 0  ;;  %v606_v6 = vsel %vm486_vm3, %v1934_v18, 0  ;;  %s2007_s5 = sshll.u32 %s1766_s20, 7  ;;  %s383_s6 = scalar_lea.vmem [#allocation10], %s1892_s8 }
  0x9b   : > { %v531_v9 = vpack.c.bf16 %v408_v5, %v1921_v7  ;;  %v649_v10 = vpack.c.bf16 %v1919_v4, %v1921_v7  ;;  %1207 = vmatpush3.bf16.xpose.msra.mxu0 %v416_v8  ;;  %v409_v11 = vpack.c.bf16 %v408_v5, %v1919_v4  ;;  %1213 = vmatpush3.bf16.msra.mxu1 %v487_v30  ;;  %v655_v45 = vsel %vm411_vm1, %v1948_v40, 0  ;;  %s942_s7 = sshll.u32 %s383_s6, 4  ;;  %s390_s27 = scalar_lea.vmem [#allocation11], %s1892_s8  ;;  %s2020_s7 = int_to_ptr.vmem [resolvable:$true] %s942_s7 }
  0x9c   : > { %1218 = vmatprep.subr.bf16.mxu0 %v1631_v0  ;;  %1230 = vmatprep.subr.bf16.mxu1 %v1631_v0  ;;  %s955_s11 = sshll.u32 %s390_s27, 4  ;;  %s2191_s17 = sld [smem:[#allocation25_spill]]  ;;  %s2029_s11 = int_to_ptr.vmem [resolvable:$true] %s955_s11 }
  0x9d   : > { %s2192_s22 = sld [smem:[#allocation26_spill]]  ;;  %s397_s23 = scalar_lea.vmem [#allocation13], %s1892_s8 }
  0x9e   : > { %s2035_s13 = sshll.u32 %s397_s23, 4  ;;  %s919_s12 = scalar_lea.sflag [#allocation4], %s1889_s21  ;;  %s969_s13 = int_to_ptr.vmem [resolvable:$true] %s2035_s13 }
  0x9f   : > { %s1489_s19 = scalar_lea.vmem %s2020_s7, 128  ;;  %p2193_p9 = scmp.ne.s32.totalorder %s2178_s16, 0 }
  0xa0   : > { %p1490_p4 = scmp.ne.s32.totalorder %s2020_s7, %s1489_s19  ;;  %s1633_s30 = smov [#allocation10]  }
  0xa1   : > { %s1493_s29 = sshll.u32 %s1633_s30, 4  ;;  %s1494_s29 = int_to_ptr.vmem [resolvable:$false] %s1493_s29 }
  0xa2   : > { %1209 = vmatmul.mubr.msk.bf16.vlgmr.msra.gmra.mrb[0].mxu0 %vm411_vm1, %v409_v11  ;;  %s2018_s9 = scalar_lea.hbm %s2191_s17, %s2007_s5  ;;  %p1491_p12 = pnand %p1490_p4, %p2193_p9 }
  0xa3   : > { %1220 = vmatprep.mubr.msk.bf16.mxu0 %vm1632_vm0, %v1631_v0  ;;  %1219 = vmatpush3.bf16.xpose.msra.mxu0 %v537_v19  ;;  %s2026_s14 = scalar_lea.hbm %s2192_s22, %s2007_s5  ;;  %s1495_s24 = scalar_lea.vmem %s1494_s29, 256 }
  0xa4   : > { %1224 = vmatprep.subr.bf16.mxu0 %v1631_v0  ;;  %p1492_p6 = pneg %p1491_p12  ;;  %p1496_p3 = scmp.lt.s32.totalorder %s2020_s7, %s1494_s29 }
  0xa5   : > { %p1497_p5 = scmp.lt.s32.totalorder %s1495_s24, %s1489_s19 }
  0xa7   : > { %p1498_p7 = por %p1497_p5, %p1496_p3 }
  0xa9   : > { %p1499_p11 = pnand %p1498_p7, %p1492_p6 }
  0xaa   : > { %1221 = vmatmul.mubr.msk.bf16.vlgmr.msra.gmra.mrb[4].mxu0 %vm411_vm1, %v531_v9 }
  0xab   : > { %1226 = vmatprep.mubr.msk.bf16.mxu0 %vm1632_vm0, %v1631_v0  ;;  %1225 = vmatpush3.bf16.msra.mxu0 %v606_v6 }
  0xac   : > { %1236 = vmatprep.subr.bf16.mxu0 %v1631_v0 }
 0x175   : > { %v452_v12 = vpop.f32.mrb[0].mxu0 }
 0x176   : > { %v1210_v13 = vpop.f32.mrb[1].mxu0  ;;  %v460_v14 = vsel %vm459_vm2, %v452_v12, -inf }
 0x177   : > { %461 = vmax.xlane.f32.xlu0 %v460_v14  ;;  %v455_v15 = vpop.f32.mrb[2].mxu0 }
 0x178   : > { %v1211_v16 = vpop.f32.mrb[3].mxu0  ;;  %v463_v17 = vsel %vm459_vm2, %v455_v15, -inf }
 0x17b   : > { %464 = vmax.xlane.f32.xlu0 %v463_v17 }
 0x17d   : > { %v573_v31 = vpop.f32.mrb[4].mxu0 }
 0x17e   : > { %v1222_v32 = vpop.f32.mrb[5].mxu0  ;;  %v580_v33 = vsel %vm459_vm2, %v573_v31, -inf }
 0x17f   : > { %581 = vmax.xlane.f32.xlu0 %v580_v33  ;;  %v576_v34 = vpop.f32.mrb[6].mxu0 }
 0x180   : > { %v583_v35 = vsel %vm459_vm2, %v576_v34, -inf  ;;  %v1223_v36 = vpop.f32.mrb[7].mxu0 }
 0x204   : > { %v462_v20 = vpop.xlane.xlu0 %461 }
 0x205   : > { %v466_v21 = vsub.f32 %v452_v12, %v462_v20 }
 0x207   : > { %v468_v22 = vmul.f32 1.442695, %v466_v21 }
 0x208   : > { %v465_v23 = vpop.xlane.xlu0 %464 }
 0x209   : > { %1341 = vpow2.f32 %v468_v22  ;;  %v467_v24 = vsub.f32 %v455_v15, %v465_v23 }
 0x20b   : > { %v470_v25 = vmul.f32 1.442695, %v467_v24  ;;  %v724_v24 = vsel %vm486_vm3, %v1948_v40, 0 }
 0x20c   : > { %v582_v48 = vpop.xlane.xlu0 %581 }
 0x20d   : > { %1343 = vpow2.f32 %v470_v25  ;;  %v586_v50 = vsub.f32 %v573_v31, %v582_v48 }
 0x20f   : > { %v588_v52 = vmul.f32 1.442695, %v586_v50 }
 0x213   : > { %v1342_v26 = vpop.eup %1341 }
 0x214   : > { %v472_v27 = vsel %vm459_vm2, %v1342_v26, 0.0 }
 0x215   : > { %473 = vadd.xlane.f32.xlu1 %v472_v27 }
 0x217   : > { %v1344_v28 = vpop.eup %1343 }
 0x218   : > { %v475_v29 = vsel %vm459_vm2, %v1344_v28, 0.0 }
 0x219   : > { %476 = vadd.xlane.f32.xlu1 %v475_v29 }
 0x21d   : > { %584 = vmax.xlane.f32.xlu1 %v583_v35 }
 0x2a2   : > { %v474_v37 = vpop.xlane.xlu1 %473 }
 0x2a3   : > { %1345 = vrcp.f32 %v474_v37 }
 0x2a6   : > { %v477_v38 = vpop.xlane.xlu1 %476 }
 0x2a7   : > { %1347 = vrcp.f32 %v477_v38 }
 0x2a8   : > { %1349 = vpow2.f32 %v588_v52 }
 0x2aa   : > { %v585_v49 = vpop.xlane.xlu1 %584 }
 0x2ab   : > { %v587_v51 = vsub.f32 %v576_v34, %v585_v49  ;;  %v1991_v49 = vld [vmem:[%s2141_s4] sm:$0x7] }
 0x2ad   : > { %v1346_v39 = vpop.eup %1345  ;;  %v590_v53 = vmul.f32 1.442695, %v587_v51 }
 0x2ae   : > { %v480_v42 = vmul.f32 %v1346_v39, %v1342_v26 }
 0x2af   : > { %1351 = vpow2.f32 %v590_v53 }
 0x2b1   : > { %v1348_v41 = vpop.eup %1347 }
 0x2b2   : > { %v481_v43 = vmul.f32 %v1348_v41, %v1344_v28  ;;  %v1350_v59 = vpop.eup %1349 }
 0x2b3   : > { %v592_v4 = vsel %vm459_vm2, %v1350_v59, 0.0 }
 0x2b4   : > { %v482_v44 = vpack.c.bf16 %v481_v43, %v480_v42 }
 0x2b6   : > { %1215 = vmatmul.mubr.msk.bf16.vlgmr.msra.gmra.mrb[0].mxu1 %vm459_vm2, %v482_v44 }
 0x2b7   : > { %1231 = vmatpush3.bf16.xpose.msra.mxu1 %v655_v45  ;;  %1232 = vmatprep.mubr.msk.bf16.mxu1 %vm1632_vm0, %v1631_v0 }
 0x2b8   : > { %1242 = vmatprep.subr.bf16.mxu1 %v1631_v0 }
 0x2b9   : > { %v1352_v63 = vpop.eup %1351 }
 0x2ba   : > { %v595_v5 = vsel %vm459_vm2, %v1352_v63, 0.0 }
 0x2be   : > { %1233 = vmatmul.mubr.msk.bf16.vlgmr.msra.gmra.mrb[4].mxu1 %vm411_vm1, %v649_v10 }
 0x2bf   : > { %1243 = vmatpush3.bf16.msra.mxu1 %v1339_v46  ;;  %1246 = vmatprep.mubr.msk.bf16.mxu1 %vm1632_vm0, %v1631_v0  ;;  %v770_v46 = vlaneseq }
 0x2c0   : > { %1244 = vmatprep.subr.bf16.mxu1 %v1631_v0 }
 0x2c3   : > { %1245 = vmatpush3.bf16.msra.mxu1 %v1340_v47  ;;  %v1985_v47 = vshrl.u32 %v770_v46, 7 }
 0x2c5   : > { %v772_v48 = vsub.s32 0, %v1985_v47 }
 0x2c7   : > { %v773_v50 = vrot.slane %v1991_v49, %v772_v48 }
 0x389   : > { %v523_v54 = vpop.f32.mrb[0].mxu1 }
 0x38a   : > { %v1216_v55 = vpop.f32.mrb[1].mxu1 }
 0x38b   : > { %v526_v56 = vpop.f32.mrb[2].mxu1 }
 0x38c   : > { %v767_v57 = vpack.c.bf16 %v526_v56, %v523_v54  ;;  %v1217_v58 = vpop.f32.mrb[3].mxu1 }
 0x38e   : > { %1247 = vmatmul.mubr.msk.bf16.vlgmr.msra.gmra.mrb[8].mxu1 %vm411_vm1, %v767_v57 }
 0x38f   : > { %1250 = vmatprep.mubr.msk.bf16.mxu1 %vm1632_vm0, %v1631_v0 }
 0x391   : > { %v691_v60 = vpop.f32.mrb[4].mxu1 }
 0x392   : > { %v1234_v61 = vpop.f32.mrb[5].mxu1  ;;  %v698_v62 = vsel %vm459_vm2, %v691_v60, -inf }
 0x393   : > { %v694_v1 = vpop.f32.mrb[6].mxu1  ;;  %699 = vmax.xlane.f32.xlu0 %v698_v62 }
 0x394   : > { %v1235_v2 = vpop.f32.mrb[7].mxu1  ;;  %v701_v3 = vsel %vm459_vm2, %v694_v1, -inf }
 0x395   : > { %702 = vmax.xlane.f32.xlu1 %v701_v3 }
 0x397   : > { %593 = vadd.xlane.f32.xlu0 %v592_v4 }
 0x399   : > { %596 = vadd.xlane.f32.xlu1 %v595_v5 }
 0x420   : > { %v700_v7 = vpop.xlane.xlu0 %699 }
 0x421   : > { %v704_v8 = vsub.f32 %v691_v60, %v700_v7 }
 0x422   : > { %v703_v9 = vpop.xlane.xlu1 %702 }
 0x423   : > { %v706_v10 = vmul.f32 1.442695, %v704_v8  ;;  %v705_v11 = vsub.f32 %v694_v1, %v703_v9 }
 0x424   : > { %v594_v12 = vpop.xlane.xlu0 %593 }
 0x425   : > { %1353 = vpow2.f32 %v706_v10  ;;  %v708_v13 = vmul.f32 1.442695, %v705_v11 }
 0x426   : > { %1355 = vrcp.f32 %v594_v12  ;;  %v597_v14 = vpop.xlane.xlu1 %596 }
 0x427   : > { %1357 = vpow2.f32 %v708_v13 }
 0x428   : > { %1359 = vrcp.f32 %v597_v14 }
 0x42f   : > { %v1354_v15 = vpop.eup %1353 }
 0x430   : > { %v1356_v16 = vpop.eup %1355  ;;  %v710_v17 = vsel %vm459_vm2, %v1354_v15, 0.0 }
 0x431   : > { %v1358_v18 = vpop.eup %1357  ;;  %711 = vadd.xlane.f32.xlu0 %v710_v17  ;;  %v600_v21 = vmul.f32 %v1356_v16, %v1350_v59 }
 0x432   : > { %v1360_v19 = vpop.eup %1359  ;;  %v713_v20 = vsel %vm459_vm2, %v1358_v18, 0.0 }
 0x433   : > { %v601_v22 = vmul.f32 %v1360_v19, %v1352_v63  ;;  %714 = vadd.xlane.f32.xlu1 %v713_v20 }
 0x435   : > { %v602_v23 = vpack.c.bf16 %v601_v22, %v600_v21 }
 0x437   : > { %1227 = vmatmul.mubr.msk.bf16.vlgmr.msra.gmra.mrb[8].mxu0 %vm459_vm2, %v602_v23 }
 0x438   : > { %1238 = vmatprep.mubr.msk.bf16.mxu0 %vm1632_vm0, %v1631_v0  ;;  %1237 = vmatpush3.bf16.msra.mxu0 %v724_v24 }
 0x461   : > { %v829_v25 = vpop.f32.mrb[8].mxu1 }
 0x462   : > { %v1248_v26 = vpop.f32.mrb[9].mxu1  ;;  %v830_v51 = vadd.f32 %v829_v25, %v773_v50 }
 0x463   : > { %v832_v27 = vpop.f32.mrb[10].mxu1 }
 0x464   : > { %v1249_v28 = vpop.f32.mrb[11].mxu1  ;;  %v852_v56 = vmax.f32 %v830_v51, 0.0  ;;  %v833_v61 = vadd.f32 %v832_v27, %v773_v50 }
 0x466   : > { %v853_v6 = vmax.f32 %v833_v61, 0.0 }
 0x4be   : > { %v712_v29 = vpop.xlane.xlu0 %711 }
 0x4bf   : > { %1361 = vrcp.f32 %v712_v29 }
 0x4c0   : > { %v715_v30 = vpop.xlane.xlu1 %714 }
 0x4c1   : > { %1363 = vrcp.f32 %v715_v30 }
 0x4c9   : > { %v1362_v31 = vpop.eup %1361 }
 0x4ca   : > { %v718_v33 = vmul.f32 %v1362_v31, %v1354_v15 }
 0x4cb   : > { %v1364_v32 = vpop.eup %1363 }
 0x4cc   : > { %v719_v34 = vmul.f32 %v1364_v32, %v1358_v18 }
 0x4ce   : > { %v720_v35 = vpack.c.bf16 %v719_v34, %v718_v33 }
 0x4d0   : > { %1239 = vmatmul.mubr.msk.bf16.vlgmr.msra.gmra.mrb[12].mxu0 %vm459_vm2, %v720_v35 }
 0x50a   : > { %v642_v36 = vpop.f32.mrb[8].mxu0 }
 0x50b   : > { %v1228_v37 = vpop.f32.mrb[9].mxu0 }
 0x50c   : > { %v645_v38 = vpop.f32.mrb[10].mxu0  ;;  %v875_v37 = vsub.s32 1, %v1985_v47 }
 0x50d   : > { %v768_v39 = vpack.c.bf16 %v645_v38, %v642_v36  ;;  %v1229_v40 = vpop.f32.mrb[11].mxu0  ;;  %v880_v38 = vsub.s32 2, %v1985_v47 }
 0x50f   : > { %1251 = vmatmul.mubr.msk.bf16.gmra.mrb[12].mxu1 %vm411_vm1, %v768_v39  ;;  %v876_v39 = vrot.slane %v1991_v49, %v875_v37 }
 0x510   : > { %1254 = vmatprep.mubr.msk.bf16.mxu1 %vm1632_vm0, %v1631_v0 }
 0x5a3   : > { %v760_v41 = vpop.f32.mrb[12].mxu0 }
 0x5a4   : > { %v1240_v42 = vpop.f32.mrb[13].mxu0 }
 0x5a5   : > { %v763_v43 = vpop.f32.mrb[14].mxu0  ;;  %v2004_v42 = vrot.slane %v1991_v49, %v880_v38 }
 0x5a6   : > { %v769_v44 = vpack.c.bf16 %v763_v43, %v760_v41  ;;  %v1241_v45 = vpop.f32.mrb[15].mxu0 }
 0x5a8   : > { %1255 = vmatmul.mubr.msk.bf16.gmra.mrb[16].mxu1 %vm411_vm1, %v769_v44 }
 0x5e2   : > { %v837_v0 = vpop.f32.mrb[12].mxu1 }
 0x5e3   : > { %v1252_v52 = vpop.f32.mrb[13].mxu1  ;;  %v838_v59 = vadd.f32 %v837_v0, %v773_v50 }
 0x5e4   : > { %v840_v53 = vpop.f32.mrb[14].mxu1 }
 0x5e5   : > { %v841_v54 = vadd.f32 %v840_v53, %v773_v50  ;;  %v1253_v55 = vpop.f32.mrb[15].mxu1  ;;  %v854_v2 = vmax.f32 %v838_v59, 0.0 }
 0x5e7   : > { %v855_v57 = vmax.f32 %v841_v54, 0.0 }
 0x5e9   : > { %v901_v58 = vadd.f32 %v855_v57, %v852_v56 }
 0x5eb   : > { %v902_v12 = vsel %vm411_vm1, %v901_v58, 0.0 }
 0x67b   : > { %v845_v60 = vpop.f32.mrb[16].mxu1 }
 0x67c   : > { %v846_v62 = vadd.f32 %v845_v60, %v773_v50  ;;  %v1256_v63 = vpop.f32.mrb[17].mxu1 }
 0x67d   : > { %v848_v1 = vpop.f32.mrb[18].mxu1 }
 0x67e   : > { %v856_v3 = vmax.f32 %v846_v62, 0.0  ;;  %v849_v4 = vadd.f32 %v848_v1, %v773_v50  ;;  %v1257_v5 = vpop.f32.mrb[19].mxu1 }
 0x680   : > { %v857_v7 = vmax.f32 %v849_v4, 0.0  ;;  %v858_v8 = vadd.f32 %v856_v3, %v854_v2 }
 0x682   : > { %v859_v9 = vsel %vm411_vm1, %v858_v8, 0.0  ;;  %v884_v10 = vadd.f32 %v857_v7, %v853_v6 }
 0x683   : > { %860 = vadd.xlane.f32.xlu1 %v859_v9 }
 0x684   : > { %v885_v11 = vsel %vm411_vm1, %v884_v10, 0.0 }
 0x685   : > { %886 = vadd.xlane.f32.xlu0 %v885_v11 }
 0x689   : > { %903 = vadd.xlane.f32.xlu0 %v902_v12 }
 0x710   : > { %v861_v13 = vpop.xlane.xlu1 %860 }
 0x711   : > { %v863_v14 = vmul.f32 0.03125, %v861_v13 }
 0x712   : > { %v887_v15 = vpop.xlane.xlu0 %886 }
 0x713   : > { %v864_v16 = vsub.f32 %v858_v8, %v863_v14  ;;  %v888_v17 = vmul.f32 0.03125, %v887_v15 }
 0x715   : > { %v889_v18 = vsub.f32 %v884_v10, %v888_v17  ;;  %v865_v19 = vmul.f32 %v864_v16, %v864_v16 }
 0x716   : > { %v904_v20 = vpop.xlane.xlu0 %903 }
 0x717   : > { %v905_v21 = vmul.f32 0.03125, %v904_v20  ;;  %v866_v22 = vsel %vm411_vm1, %v865_v19, 0.0  ;;  %v890_v23 = vmul.f32 %v889_v18, %v889_v18 }
 0x718   : > { %867 = vadd.xlane.f32.xlu0 %v866_v22 }
 0x719   : > { %v906_v24 = vsub.f32 %v901_v58, %v905_v21  ;;  %v891_v25 = vsel %vm411_vm1, %v890_v23, 0.0 }
 0x71a   : > { %892 = vadd.xlane.f32.xlu1 %v891_v25 }
 0x71b   : > { %v907_v26 = vmul.f32 %v906_v24, %v906_v24 }
 0x71d   : > { %v908_v27 = vsel %vm411_vm1, %v907_v26, 0.0 }
 0x71e   : > { %909 = vadd.xlane.f32.xlu1 %v908_v27 }
 0x7a5   : > { %v868_v28 = vpop.xlane.xlu0 %867 }
 0x7a6   : > { %v869_v29 = vmul.f32 0.03125, %v868_v28 }
 0x7a7   : > { %v893_v30 = vpop.xlane.xlu1 %892 }
 0x7a8   : > { %v870_v31 = vadd.f32 1e-05, %v869_v29  ;;  %v894_v32 = vmul.f32 0.03125, %v893_v30 }
 0x7aa   : > { %1365 = vrsqrt.f32 %v870_v31  ;;  %v895_v33 = vadd.f32 1e-05, %v894_v32 }
 0x7ab   : > { %v910_v34 = vpop.xlane.xlu1 %909 }
 0x7ac   : > { %1367 = vrsqrt.f32 %v895_v33  ;;  %v911_v35 = vmul.f32 0.03125, %v910_v34 }
 0x7ae   : > { %v912_v36 = vadd.f32 1e-05, %v911_v35 }
 0x7b0   : > { %1369 = vrsqrt.f32 %v912_v36 }
 0x7b4   : > { %v1366_v40 = vpop.eup %1365 }
 0x7b5   : > { %v872_v41 = vmul.f32 %v1366_v40, %v864_v16 }
 0x7b6   : > { %v1368_v43 = vpop.eup %1367 }
 0x7b7   : > { %v877_v44 = vmul.f32 %v876_v39, %v872_v41  ;;  %v897_v45 = vmul.f32 %v1368_v43, %v889_v18 }
 0x7b9   : > { %v898_v46 = vmul.f32 %v897_v45, %v876_v39  ;;  %v882_v47 = vadd.f32 %v2004_v42, %v877_v44 }
 0x7ba   : > { %v1370_v48 = vpop.eup %1369 }
 0x7bb   : > { %v914_v49 = vmul.f32 %v1370_v48, %v906_v24  ;;  %v899_v50 = vadd.f32 %v898_v46, %v2004_v42  ;;  %883 = vst.msk [vmem:[%s383_s6] sm:$0xff] %vm411_vm1, %v882_v47 }
 0x7bc   : > { %1502 = shalt.err (!%p1499_p11)
}
 0x7bd   : > { %s1503_s21 = scalar_lea.hbm %s2018_s9, 128  ;;  %s1507_s15 = scalar_lea.hbm %s2191_s17, 256 }
 0x7be   : > { %p1504_p0 = scmp.ne.s32.totalorder %s2018_s9, %s1503_s21  ;;  %p1508_p8 = scmp.lt.u32.totalorder %s2018_s9, %s2191_s17 }
 0x7bf   : > { %p1509_p1 = scmp.lt.u32.totalorder %s1507_s15, %s1503_s21  ;;  %p1511_p4 = scmp.lt.u32.totalorder %s1503_s21, %s2018_s9 }
 0x7c0   : > { %p1505_p13 = pnand %p1504_p0, %p2193_p9 }
 0x7c1   : > { %p1510_p2 = por %p1509_p1, %p1508_p8 }
 0x7c2   : > { %p1506_p10 = pneg %p1505_p13 }
 0x7c3   : > { %p1512_p12 = por %p1511_p4, %p1510_p2 }
 0x7c5   : > { %p1513_p6 = pnand %p1512_p12, %p1506_p10 }
 0x7c7   : > { %1516 = shalt.err (!%p1513_p6)
}
 0x7c8   : > { %1268 = dma.vmem_to_hbm [thread:$0]  (%p2193_p9), %s2020_s7, 128, %s2018_s9, %s919_s12   ;;  %v915_v0 = vmul.f32 %v914_v49, %v876_v39  ;;  %900 = vst.msk [vmem:[%s390_s27] sm:$0xff] %vm411_vm1, %v899_v50 }
 0x7c9   : > { %s2064_s19 = scalar_lea.sflag [#allocation12], %s330_s28  ;;  %s1517_s30 = scalar_lea.vmem %s2029_s11, 128 }
 0x7ca   : > { %p1518_p3 = scmp.ne.s32.totalorder %s2029_s11, %s1517_s30  ;;  %s1634_s29 = smov [#allocation11]  }
 0x7cb   : > { %s1521_s24 = sshll.u32 %s1634_s29, 4  ;;  %s1522_s24 = int_to_ptr.vmem [resolvable:$false] %s1521_s24 }
 0x7cc   : > { %p1519_p5 = pnand %p1518_p3, %p2193_p9  ;;  %s1523_s21 = scalar_lea.vmem %s1522_s24, 256 }
 0x7cd   : > { %p1524_p11 = scmp.lt.s32.totalorder %s2029_s11, %s1522_s24  ;;  %p1525_p0 = scmp.lt.s32.totalorder %s1523_s21, %s1517_s30 }
 0x7ce   : > { %p1520_p7 = pneg %p1519_p5 }
 0x7cf   : > { %p1526_p13 = por %p1525_p0, %p1524_p11 }
 0x7d1   : > { %p1527_p10 = pnand %p1526_p13, %p1520_p7 }
 0x7d3   : > { %1530 = shalt.err (!%p1527_p10)
}
 0x7d4   : > { %s1531_s20 = scalar_lea.hbm %s2026_s14, 128  ;;  %s1535_s27 = scalar_lea.hbm %s2192_s22, 256 }
 0x7d5   : > { %p1532_p8 = scmp.ne.s32.totalorder %s2026_s14, %s1531_s20  ;;  %p1536_p4 = scmp.lt.u32.totalorder %s2026_s14, %s2192_s22 }
 0x7d6   : > { %p1537_p12 = scmp.lt.u32.totalorder %s1535_s27, %s1531_s20  ;;  %p1539_p3 = scmp.lt.u32.totalorder %s1531_s20, %s2026_s14 }
 0x7d7   : > { %p1533_p1 = pnand %p1532_p8, %p2193_p9 }
 0x7d8   : > { %p1538_p6 = por %p1537_p12, %p1536_p4 }
 0x7d9   : > { %p1534_p2 = pneg %p1533_p1 }
 0x7da   : > { %p1540_p5 = por %p1539_p3, %p1538_p6 }
 0x7dc   : > { %p1541_p7 = pnand %p1540_p5, %p1534_p2 }
 0x7de   : > { %1544 = shalt.err (!%p1541_p7)
}
 0x7df   : > { %1269 = dma.vmem_to_hbm [thread:$0]  (%p2193_p9), %s2029_s11, 128, %s2026_s14, %s2064_s19   ;;  %v916_v51 = vadd.f32 %v915_v0, %v2004_v42 }
 0x7e0   : > { %s2194_s15 = sld [smem:[#allocation27_spill]]  ;;  %s1545_s10 = scalar_lea.vmem %s969_s13, 128 }
 0x7e1   : > { %917 = vst.msk [vmem:[%s397_s23] sm:$0xff] %vm411_vm1, %v916_v51  ;;  %p1546_p11 = scmp.ne.s32.totalorder %s969_s13, %s1545_s10  ;;  %s1635_s30 = smov [#allocation13]  }
 0x7e2   : > { %s1549_s29 = sshll.u32 %s1635_s30, 4  ;;  %s1550_s29 = int_to_ptr.vmem [resolvable:$false] %s1549_s29 }
 0x7e3   : > { %p1547_p0 = pnand %p1546_p11, %p2193_p9  ;;  %s1551_s11 = scalar_lea.vmem %s1550_s29, 256 }
 0x7e4   : > { %p1552_p10 = scmp.lt.s32.totalorder %s969_s13, %s1550_s29  ;;  %p1553_p8 = scmp.lt.s32.totalorder %s1551_s11, %s1545_s10 }
 0x7e5   : > { %p1548_p13 = pneg %p1547_p0 }
 0x7e6   : > { %s2093_s1 = scalar_lea.hbm %s2194_s15, %s2007_s5  ;;  %p1554_p1 = por %p1553_p8, %p1552_p10 }
 0x7e8   : > { %p1555_p2 = pnand %p1554_p1, %p1548_p13 }
 0x7ea   : > { %1558 = shalt.err (!%p1555_p2)
}
 0x7eb   : > { %s1559_s8 = scalar_lea.hbm %s2093_s1, 128  ;;  %s1563_s23 = scalar_lea.hbm %s2194_s15, 256 }
 0x7ec   : > { %p1560_p4 = scmp.ne.s32.totalorder %s2093_s1, %s1559_s8  ;;  %p1564_p3 = scmp.lt.u32.totalorder %s2093_s1, %s2194_s15 }
 0x7ed   : > { %p1565_p5 = scmp.lt.u32.totalorder %s1563_s23, %s1559_s8  ;;  %p1567_p11 = scmp.lt.u32.totalorder %s1559_s8, %s2093_s1 }
 0x7ee   : > { %p1561_p12 = pnand %p1560_p4, %p2193_p9 }
 0x7ef   : > { %p1566_p7 = por %p1565_p5, %p1564_p3 }
 0x7f0   : > { %p1562_p6 = pneg %p1561_p12 }
 0x7f1   : > { %p1568_p0 = por %p1567_p11, %p1566_p7 }
 0x7f3   : > { %p1569_p13 = pnand %p1568_p0, %p1562_p6 }
 0x7f5   : > { %1572 = shalt.err (!%p1569_p13)
}
 0x7f6   : > { %1270 = dma.vmem_to_hbm [thread:$0]  (%p2193_p9), %s969_s13, 128, %s2093_s1, %s2064_s19  }
 0x7f7 PF: > { %s2195_s20 = sld [smem:[#allocation19_spill]]  ;;  %s2196_s28 = sld [smem:[#allocation23_spill]] }
 0x7f8   : > { %s2197_s7 = sld [smem:[#allocation20_spill]] }
 0x7fd   : > { %s980_s27 = sand.u32 1, %s2195_s20   ;;  %p2198_p10 = scmp.ne.s32.totalorder %s2196_s28, 0 }
 0x7fe   : > { %p2199_p8 = scmp.ge.s32.totalorder %s2197_s7, 2  ;;  %s981_s9 = scalar_lea.sflag [#allocation4], %s980_s27 }
 0x800   : > { %p1289_p1 = pnand %p2199_p8, %p2198_p10 }
 0x802   : > { %1602 = dma.done.wait (!%p1289_p1), %s981_s9, 128  }
 0x803   : > { %1604 = vsyncadd (!%p1289_p1), %s981_s9, 4294967168  ;;  %s2200_s12 = sadd.s32 4294967294, %s2197_s7  }
 0x804   : > { %s989_s6 = sand.u32 1, %s2200_s12  }
 0x805   : > { %s990_s18 = scalar_lea.sflag [#allocation12], %s989_s6 }
 0x806   : > { %1606 = dma.done.wait (!%p1289_p1), %s990_s18, 256  }
 0x807   : > { %1608 = vsyncadd (!%p1289_p1), %s990_s18, 4294967040  ;;  %s2201_s27 = sld [smem:[#allocation21_spill]]  ;;  %s2202_s16 = sld [smem:[#allocation22_spill]] }
 0x808   : > { %s2203_s24 = smov %s1615_s25  ;;  %s2204_s25 = smov %s1619_s26 }
 0x80d   : > { %p28_p9 = scmp.ge.s32.totalorder %s2201_s27, 4   ;;  %s2205_s26 = smov %s2202_s16 }
 0x80f   :  { %30 = sbr.rel (!%p28_p9) target bundleno = 15 (0xf), region = 145 }
 0x816   :  { %1004 = vsyncpa [#allocation3], 1 }
 0x817   :  { %1006 = vsyncpa [#allocation3 + $0x1], 1 }
 0x818   :  { %1007 = vsyncpa [#allocation6], 1 }
 0x819   :  { %1009 = vsyncpa [#allocation6 + $0x1], 1 }
 0x81a   :  { %1010 = vsyncpa [#allocation9], 1 }
 0x81b   :  { %1011 = vsyncpa [#allocation4], 1 }
 0x81c   :  { %1013 = vsyncpa [#allocation4 + $0x1], 1 }
 0x81d   :  { %1014 = vsyncpa [#allocation12], 1 }
 0x81e   :  { %1016 = vsyncpa [#allocation12 + $0x1], 1 }

</bundles_post_ra>
